<compile_context>
chip_gen: v6e
topology: v6e:2x2x1
jax: 0.10.0
libtpu: 0.0.40
codegen_flags: <defaults>
</compile_context>

<pallas_src>
import functools

import jax
import jax.numpy as jnp
from jax.experimental import pallas as pl
from jax.experimental.pallas import tpu as pltpu

# ----------------------------- config ---------------------------------------
BATCH = 2
IN_C = 4
OUT_C = 8
IM_SIZE = 16
KSIZE, STRIDE, PAD = 4, 2, 1
SLOPE = 0.2
BN_EPS = 1e-5

LANE = 128            # TPU lane width
SUBLANE = 8           # TPU sublane width
MAX_TM = 1024         # row tile for the (non-fused) fallback path
FUSED_VMEM_BUDGET = 8 * 1024 * 1024   # keep well inside the 16 MiB v5e default


def _round_up(x, m):
    return (x + m - 1) // m * m


def _k_tiling(kdim):
    """Return (padded K, K tile) for the reduction dimension."""
    if kdim <= 1024:
        kp = _round_up(kdim, SUBLANE)
        return kp, kp
    return _round_up(kdim, 512), 512


def _n_tile(np_):
    """256-wide N tiles feed the v6e/v7x 256x256 MXU; 128 otherwise."""
    return 256 if np_ % 256 == 0 else LANE


# ----------------------------- Pallas kernels --------------------------------
def _fused_matmul_bn_lrelu_kernel(a_ref, b_ref, bias_ref, gb_ref, o_ref,
                                  *, m_valid, mask_rows, inv_n, eps, slope):
    """Fully fused conv-as-matmul + bias + BN(batch stats) + LeakyReLU.

    Grid = (j: out-col tiles, k: reduction tiles).  The (M, tn) f32 output
    block is VMEM-resident across k: it is initialized with the bias at k == 0,
    accumulated into directly (no acc scratch), and at the last k the batch
    statistics + affine + LeakyReLU are applied in place.
    """
    k = pl.program_id(1)

    @pl.when(k == 0)
    def _():
        o_ref[...] = jnp.broadcast_to(bias_ref[0:1, :], o_ref.shape)

    o_ref[...] += jnp.dot(a_ref[...], b_ref[...],
                          preferred_element_type=jnp.float32)

    @pl.when(k == pl.num_programs(1) - 1)
    def _():
        y = o_ref[...]
        if mask_rows:                                  # trace-time switch
            rows = jax.lax.broadcasted_iota(jnp.int32, y.shape, 0)
            yz = jnp.where(rows < m_valid, y, 0.0)
        else:
            yz = y
        mean = jnp.sum(yz, axis=0, keepdims=True) * inv_n
        # TODO(synk): E[x^2]-E[x]^2 can lose precision for large-mean
        # activations; switch to a shifted two-pass variance if needed.
        var = jnp.maximum(
            jnp.sum(yz * yz, axis=0, keepdims=True) * inv_n - mean * mean, 0.0)
        scale = gb_ref[0:1, :] * jax.lax.rsqrt(var + eps)
        shift = gb_ref[1:2, :] - mean * scale
        v = y * scale + shift
        o_ref[...] = jnp.where(v >= 0.0, v, slope * v)


def _matmul_bias_stats_kernel(a_ref, b_ref, bias_ref, y_ref, stats_ref,
                              acc_ref, *, m_valid, tm, mask_rows):
    """Fallback matmul: y(bf16) = A @ B + bias with PER-ROW-TILE partial stats.

    Grid = (i, j, k) with i outermost.  stats output is indexed by (i, j), so
    both i and j can be 'parallel' (megacore-safe); partials are reduced by a
    tiny jnp.sum in the wrapper.
    """
    i = pl.program_id(0)
    k = pl.program_id(2)

    @pl.when(k == 0)
    def _():
        acc_ref[...] = jnp.broadcast_to(bias_ref[0:1, :], acc_ref.shape)

    acc_ref[...] += jnp.dot(a_ref[...], b_ref[...],
                            preferred_element_type=jnp.float32)

    @pl.when(k == pl.num_programs(2) - 1)
    def _():
        y = acc_ref[...]
        if mask_rows:
            rows = i * tm + jax.lax.broadcasted_iota(jnp.int32, y.shape, 0)
            yz = jnp.where(rows < m_valid, y, 0.0)
        else:
            yz = y
        s = jnp.sum(yz, axis=0, keepdims=True)
        ss = jnp.sum(yz * yz, axis=0, keepdims=True)
        pad = jnp.zeros((stats_ref.shape[0] - 2, s.shape[1]), s.dtype)
        stats_ref[...] = jnp.concatenate([s, ss, pad], axis=0)
        y_ref[...] = y.astype(y_ref.dtype)


def _bn_affine_leaky_kernel(y_ref, stats_ref, gb_ref, o_ref,
                            *, inv_n, eps, slope):
    """Fallback epilogue: per-channel BN affine (from reduced stats) + LeakyReLU."""
    mean = stats_ref[0:1, :] * inv_n
    var = jnp.maximum(stats_ref[1:2, :] * inv_n - mean * mean, 0.0)
    scale = gb_ref[0:1, :] * jax.lax.rsqrt(var + eps)
    shift = gb_ref[1:2, :] - mean * scale
    v = y_ref[...].astype(jnp.float32) * scale + shift
    o_ref[...] = jnp.where(v >= 0.0, v, slope * v)


# ----------------------------- conv plumbing (layout glue) -------------------
def im2col(x, kh, kw, stride, pad):
    """x: (N,H,W,C) -> patches (N*OH*OW, kh*kw*C), ordering (kh, kw, C)."""
    N, H, W, C = x.shape
    xp = jnp.pad(x, ((0, 0), (pad, pad), (pad, pad), (0, 0)))
    OH = (H + 2 * pad - kh) // stride + 1
    OW = (W + 2 * pad - kw) // stride + 1
    cols = []
    for i in range(kh):
        for j in range(kw):
            cols.append(xp[:, i:i + stride * OH:stride,
                           j:j + stride * OW:stride, :])
    patches = jnp.stack(cols, axis=3)              # (N, OH, OW, kh*kw, C)
    return patches.reshape(N * OH * OW, kh * kw * C), OH, OW


def prepare_conv_block(w, b, gamma, beta, *, k, stride, pad):
    """One-time weight prep: reshape + pad + bf16 cast (hoisted off hot path)."""
    oc, ic, kh, kw = w.shape
    kdim = kh * kw * ic
    kp, tk = _k_tiling(kdim)
    np_ = _round_up(oc, LANE)
    w2 = jnp.transpose(w, (2, 3, 1, 0)).reshape(kdim, oc)          # (K, OC)
    w_p = (jnp.zeros((kp, np_), jnp.bfloat16)
           .at[:kdim, :oc].set(w2.astype(jnp.bfloat16)))
    bias_p = jnp.zeros((SUBLANE, np_), jnp.float32).at[0, :oc].set(b)
    gb_p = (jnp.zeros((SUBLANE, np_), jnp.float32)
            .at[0, :oc].set(gamma).at[1, :oc].set(beta))
    return dict(w=w_p, bias=bias_p, gb=gb_p, oc=oc, ic=ic, kdim=kdim,
                kp=kp, tk=tk, np=np_, k=k, stride=stride, pad=pad)


def conv_block_apply(prep, x_nchw):
    """Forward pass of ConvBlock on an NCHW f32 input; returns NCHW f32."""
    # bf16 BEFORE im2col: halves every wrapper-side patch intermediate;
    # operands end up bf16 on the MXU anyway.
    x = jnp.transpose(x_nchw, (0, 2, 3, 1)).astype(jnp.bfloat16)   # NHWC bf16
    n = x.shape[0]
    patches, oh, ow = im2col(x, prep["k"], prep["k"],
                             prep["stride"], prep["pad"])
    m, kdim = patches.shape
    kp, tk, np_, oc = prep["kp"], prep["tk"], prep["np"], prep["oc"]
    tn = _n_tile(np_)

    # ---------- fused single-kernel path (whole row slab VMEM-resident) ------
    mp_fused = _round_up(m, SUBLANE)
    fused_bytes = (2 * mp_fused * tk * 2        # A, double-buffered bf16
                   + 2 * tk * tn * 2            # B, double-buffered bf16
                   + 2 * mp_fused * tn * 4)     # resident f32 output block
    use_fused = fused_bytes <= FUSED_VMEM_BUDGET

    a = patches                                  # already bf16
    if use_fused:
        mp = mp_fused
        if (mp, kp) != (m, kdim):                # only pad when required
            a = jnp.pad(a, ((0, mp - m), (0, kp - kdim)))
        out_p = pl.pallas_call(
            functools.partial(_fused_matmul_bn_lrelu_kernel,
                              m_valid=m, mask_rows=(mp != m),
                              inv_n=1.0 / m, eps=BN_EPS, slope=SLOPE),
            out_shape=jax.ShapeDtypeStruct((mp, np_), jnp.float32),
            grid_spec=pltpu.PrefetchScalarGridSpec(
                num_scalar_prefetch=0,
                grid=(np_ // tn, kp // tk),
                in_specs=[
                    pl.BlockSpec((mp, tk), lambda j, k: (0, k)),
                    pl.BlockSpec((tk, tn), lambda j, k: (k, j)),
                    pl.BlockSpec((SUBLANE, tn), lambda j, k: (0, j)),
                    pl.BlockSpec((SUBLANE, tn), lambda j, k: (0, j)),
                ],
                out_specs=pl.BlockSpec((mp, tn), lambda j, k: (0, j)),
            ),
            compiler_params=pltpu.CompilerParams(
                dimension_semantics=("parallel", "arbitrary")),
        )(a, prep["w"], prep["bias"], prep["gb"])
    # ---------- fallback: two kernels, bf16 intermediate, partial stats ------
    else:
        tm = min(MAX_TM, _round_up(m, SUBLANE))
        mp = _round_up(m, tm)
        if (mp, kp) != (m, kdim):
            a = jnp.pad(a, ((0, mp - m), (0, kp - kdim)))
        num_i = mp // tm
        y_bf16, stats_parts = pl.pallas_call(
            functools.partial(_matmul_bias_stats_kernel,
                              m_valid=m, tm=tm, mask_rows=(mp != m)),
            out_shape=(jax.ShapeDtypeStruct((mp, np_), jnp.bfloat16),
                       jax.ShapeDtypeStruct((num_i * SUBLANE, np_),
                                            jnp.float32)),
            grid_spec=pltpu.PrefetchScalarGridSpec(
                num_scalar_prefetch=0,
                grid=(num_i, np_ // tn, kp // tk),   # i outermost: A streamed once
                in_specs=[
                    pl.BlockSpec((tm, tk), lambda i, j, k: (i, k)),
                    pl.BlockSpec((tk, tn), lambda i, j, k: (k, j)),
                    pl.BlockSpec((SUBLANE, tn), lambda i, j, k: (0, j)),
                ],
                out_specs=[
                    pl.BlockSpec((tm, tn), lambda i, j, k: (i, j)),
                    pl.BlockSpec((SUBLANE, tn), lambda i, j, k: (i, j)),
                ],
                scratch_shapes=[pltpu.VMEM((tm, tn), jnp.float32)],
            ),
            compiler_params=pltpu.CompilerParams(
                dimension_semantics=("parallel", "parallel", "arbitrary")),
        )(a, prep["w"], prep["bias"])

        # tiny reduction of per-row-tile partial stats
        stats = stats_parts.reshape(num_i, SUBLANE, np_).sum(axis=0)

        out_p = pl.pallas_call(
            functools.partial(_bn_affine_leaky_kernel,
                              inv_n=1.0 / m, eps=BN_EPS, slope=SLOPE),
            out_shape=jax.ShapeDtypeStruct((mp, np_), jnp.float32),
            grid_spec=pltpu.PrefetchScalarGridSpec(
                num_scalar_prefetch=0,
                grid=(mp // tm, np_ // tn),
                in_specs=[
                    pl.BlockSpec((tm, tn), lambda i, j: (i, j)),
                    pl.BlockSpec((SUBLANE, tn), lambda i, j: (0, j)),
                    pl.BlockSpec((SUBLANE, tn), lambda i, j: (0, j)),
                ],
                out_specs=pl.BlockSpec((tm, tn), lambda i, j: (i, j)),
            ),
            compiler_params=pltpu.CompilerParams(
                dimension_semantics=("parallel", "parallel")),
        )(y_bf16, stats, prep["gb"])

    # Wrapper glue: keep NCHW to match the PyTorch module spec.  If the
    # consumer accepts NHWC, return out_p[:m, :oc].reshape(n, oh, ow, oc)
    # directly and skip this transpose.
    out = out_p[:m, :oc].reshape(n, oh, ow, oc)
    return jnp.transpose(out, (0, 3, 1, 2))


# ----------------------------- pure-JAX reference -----------------------------
def conv_block_reference(x, w, b, gamma, beta):
    y = jax.lax.conv_general_dilated(
        x, w, window_strides=(STRIDE, STRIDE),
        padding=[(PAD, PAD), (PAD, PAD)],
        dimension_numbers=("NCHW", "OIHW", "NCHW"),
        precision=jax.lax.Precision.HIGHEST)
    y = y + b[None, :, None, None]
    mean = jnp.mean(y, axis=(0, 2, 3), keepdims=True)
    var = jnp.var(y, axis=(0, 2, 3), keepdims=True)      # biased, as PyTorch BN
    yn = (y - mean) / jnp.sqrt(var + BN_EPS)
    yn = yn * gamma[None, :, None, None] + beta[None, :, None, None]
    return jnp.where(yn >= 0.0, yn, SLOPE * yn)


# ----------------------------- main -------------------------------------------
if __name__ == "__main__":
    root = jax.random.PRNGKey(0)
    kx, kw, kb, kg, kbe = jax.random.split(root, 5)

    x = jax.random.normal(kx, (BATCH, IN_C, IM_SIZE, IM_SIZE), jnp.float32)
    w = 0.05 * jax.random.normal(kw, (OUT_C, IN_C, KSIZE, KSIZE), jnp.float32)
    b = 0.05 * jax.random.normal(kb, (OUT_C,), jnp.float32)
    gamma = 1.0 + 0.1 * jax.random.normal(kg, (OUT_C,), jnp.float32)
    beta = 0.1 * jax.random.normal(kbe, (OUT_C,), jnp.float32)

    prep = prepare_conv_block(w, b, gamma, beta, k=KSIZE, stride=STRIDE,
                              pad=PAD)
    fwd = jax.jit(lambda xin: conv_block_apply(prep, xin))

    out = jax.block_until_ready(fwd(x))

    oh = (IM_SIZE + 2 * PAD - KSIZE) // STRIDE + 1
    assert out.shape == (BATCH, OUT_C, oh, oh)
    assert bool(jnp.all(jnp.isfinite(out)))

    ref = conv_block_reference(x, w, b, gamma, beta)
    max_err = float(jnp.max(jnp.abs(out - ref)))
    # bf16 MXU operands (f32 accumulation) -> small deviation from f32 ref.
    assert max_err < 0.15, f"max abs error vs reference too large: {max_err}"

    print("KERNEL_OK")
</pallas_src>

<mosaic_0001>
module attributes {stable_mosaic.version = 11 : i64} {
  func.func @_fused_matmul_bn_lrelu_kernel(%arg0: i32, %arg1: i32, %arg2: memref<128x64xbf16, #tpu.memory_space<vmem>>, %arg3: memref<64x128xbf16, #tpu.memory_space<vmem>>, %arg4: memref<8x128xf32, #tpu.memory_space<vmem>>, %arg5: memref<8x128xf32, #tpu.memory_space<vmem>>, %arg6: memref<128x128xf32, #tpu.memory_space<vmem>>) attributes {dimension_semantics = [#tpu.dimension_semantics<parallel>, #tpu.dimension_semantics<arbitrary>], iteration_bounds = array<i64: 1, 1>, scalar_prefetch = 0 : i64, scratch_operands = 0 : i64, tpu.core_type = #tpu.core_type<tc>, window_params = [{transform_indices = @transform_0, window_bounds = array<i64: 128, 64>}, {transform_indices = @transform_1, window_bounds = array<i64: 64, 128>}, {transform_indices = @transform_2, window_bounds = array<i64: 8, 128>}, {transform_indices = @transform_3, window_bounds = array<i64: 8, 128>}, {transform_indices = @transform_4, window_bounds = array<i64: 128, 128>}]} {
    %c0_i32 = arith.constant 0 : i32
    %0 = arith.cmpi eq, %arg1, %c0_i32 : i32
    %1 = arith.extui %0 : i1 to i32
    %c0_i32_0 = arith.constant 0 : i32
    %2 = arith.cmpi ne, %1, %c0_i32_0 : i32
    scf.if %2 {
      %c0_10 = arith.constant 0 : index
      %c0_11 = arith.constant 0 : index
      %12 = vector.load %arg4[%c0_10, %c0_11] : memref<8x128xf32, #tpu.memory_space<vmem>>, vector<1x128xf32>
      %13 = vector.shape_cast %12 : vector<1x128xf32> to vector<1x128xf32>
      %14 = vector.broadcast %13 : vector<1x128xf32> to vector<128x128xf32>
      %c0_12 = arith.constant 0 : index
      %c0_13 = arith.constant 0 : index
      %15 = vector.load %arg6[%c0_12, %c0_13] : memref<128x128xf32, #tpu.memory_space<vmem>>, vector<128x128xf32>
      tpu.vector_store %arg6[%c0_12, %c0_13], %14 {strides = array<i32>} : memref<128x128xf32, #tpu.memory_space<vmem>>, vector<128x128xf32>,
    } else {
    }
    %c0 = arith.constant 0 : index
    %c0_1 = arith.constant 0 : index
    %3 = vector.load %arg6[%c0, %c0_1] : memref<128x128xf32, #tpu.memory_space<vmem>>, vector<128x128xf32>
    %c0_2 = arith.constant 0 : index
    %c0_3 = arith.constant 0 : index
    %4 = vector.load %arg2[%c0_2, %c0_3] : memref<128x64xbf16, #tpu.memory_space<vmem>>, vector<128x64xbf16>
    %c0_4 = arith.constant 0 : index
    %c0_5 = arith.constant 0 : index
    %5 = vector.load %arg3[%c0_4, %c0_5] : memref<64x128xbf16, #tpu.memory_space<vmem>>, vector<64x128xbf16>
    %cst = arith.constant dense<0.000000e+00> : vector<128x128xf32>
    %6 = tpu.matmul %4, %5, %cst {dimension_numbers = #tpu.dot_dimension_numbers<[1], [0], [0], [1], [0, 0, 1, 1], [], []>} : vector<128x64xbf16>, vector<64x128xbf16>, vector<128x128xf32> -> vector<128x128xf32>
    %7 = arith.addf %3, %6 : vector<128x128xf32>
    %c0_6 = arith.constant 0 : index
    %c0_7 = arith.constant 0 : index
    %8 = vector.load %arg6[%c0_6, %c0_7] : memref<128x128xf32, #tpu.memory_space<vmem>>, vector<128x128xf32>
    tpu.vector_store %arg6[%c0_6, %c0_7], %7 {strides = array<i32>} : memref<128x128xf32, #tpu.memory_space<vmem>>, vector<128x128xf32>,
    %c0_i32_8 = arith.constant 0 : i32
    %9 = arith.cmpi eq, %arg1, %c0_i32_8 : i32
    %10 = arith.extui %9 : i1 to i32
    %c0_i32_9 = arith.constant 0 : i32
    %11 = arith.cmpi ne, %10, %c0_i32_9 : i32
    scf.if %11 {
      %c0_10 = arith.constant 0 : index
      %c0_11 = arith.constant 0 : index
      %12 = vector.load %arg6[%c0_10, %c0_11] : memref<128x128xf32, #tpu.memory_space<vmem>>, vector<128x128xf32>
      %cst_12 = arith.constant dense<0.000000e+00> : vector<128xf32>
      %13 = vector.multi_reduction <add>, %12, %cst_12 [0] : vector<128x128xf32> to vector<128xf32>
      %14 = vector.shape_cast %13 : vector<128xf32> to vector<1x128xf32>
      %cst_13 = arith.constant 7.812500e-03 : f32
      %15 = vector.broadcast %cst_13 : f32 to vector<1x128xf32>
      %16 = arith.mulf %14, %15 : vector<1x128xf32>
      %17 = arith.mulf %12, %12 : vector<128x128xf32>
      %cst_14 = arith.constant dense<0.000000e+00> : vector<128xf32>
      %18 = vector.multi_reduction <add>, %17, %cst_14 [0] : vector<128x128xf32> to vector<128xf32>
      %19 = vector.shape_cast %18 : vector<128xf32> to vector<1x128xf32>
      %cst_15 = arith.constant 7.812500e-03 : f32
      %20 = vector.broadcast %cst_15 : f32 to vector<1x128xf32>
      %21 = arith.mulf %19, %20 : vector<1x128xf32>
      %22 = arith.mulf %16, %16 : vector<1x128xf32>
      %23 = arith.subf %21, %22 : vector<1x128xf32>
      %cst_16 = arith.constant 0.000000e+00 : f32
      %24 = vector.broadcast %cst_16 : f32 to vector<1x128xf32>
      %25 = arith.maximumf %23, %24 : vector<1x128xf32>
      %c0_17 = arith.constant 0 : index
      %c0_18 = arith.constant 0 : index
      %26 = vector.load %arg5[%c0_17, %c0_18] : memref<8x128xf32, #tpu.memory_space<vmem>>, vector<1x128xf32>
      %cst_19 = arith.constant 9.99999974E-6 : f32
      %27 = vector.broadcast %cst_19 : f32 to vector<1x128xf32>
      %28 = arith.addf %25, %27 : vector<1x128xf32>
      %29 = math.rsqrt %28 : vector<1x128xf32>
      %30 = arith.mulf %26, %29 : vector<1x128xf32>
      %c1 = arith.constant 1 : index
      %c0_20 = arith.constant 0 : index
      %31 = vector.load %arg5[%c1, %c0_20] : memref<8x128xf32, #tpu.memory_space<vmem>>, vector<1x128xf32>
      %32 = arith.mulf %16, %30 : vector<1x128xf32>
      %33 = arith.subf %31, %32 : vector<1x128xf32>
      %34 = vector.broadcast %30 : vector<1x128xf32> to vector<128x128xf32>
      %35 = arith.mulf %12, %34 : vector<128x128xf32>
      %36 = vector.broadcast %33 : vector<1x128xf32> to vector<128x128xf32>
      %37 = arith.addf %35, %36 : vector<128x128xf32>
      %cst_21 = arith.constant 0.000000e+00 : f32
      %38 = vector.broadcast %cst_21 : f32 to vector<128x128xf32>
      %39 = arith.cmpf oge, %37, %38 : vector<128x128xf32>
      %cst_22 = arith.constant 2.000000e-01 : f32
      %40 = vector.broadcast %cst_22 : f32 to vector<128x128xf32>
      %41 = arith.mulf %40, %37 : vector<128x128xf32>
      %42 = arith.select %39, %37, %41 : vector<128x128xi1>, vector<128x128xf32>
      %c0_23 = arith.constant 0 : index
      %c0_24 = arith.constant 0 : index
      %43 = vector.load %arg6[%c0_23, %c0_24] : memref<128x128xf32, #tpu.memory_space<vmem>>, vector<128x128xf32>
      tpu.vector_store %arg6[%c0_23, %c0_24], %42 {strides = array<i32>} : memref<128x128xf32, #tpu.memory_space<vmem>>, vector<128x128xf32>,
    } else {
    }
    return
  }
  func.func @transform_0(%arg0: i32, %arg1: i32) -> (i32, i32) {
    %c0_i32 = arith.constant 0 : i32
    %c0_i32_0 = arith.constant 0 : i32
    return %c0_i32, %arg1 : i32, i32
  }
  func.func @transform_1(%arg0: i32, %arg1: i32) -> (i32, i32) {
    %c0_i32 = arith.constant 0 : i32
    return %arg1, %arg0 : i32, i32
  }
  func.func @transform_2(%arg0: i32, %arg1: i32) -> (i32, i32) {
    %c0_i32 = arith.constant 0 : i32
    %c0_i32_0 = arith.constant 0 : i32
    return %c0_i32, %arg0 : i32, i32
  }
  func.func @transform_3(%arg0: i32, %arg1: i32) -> (i32, i32) {
    %c0_i32 = arith.constant 0 : i32
    %c0_i32_0 = arith.constant 0 : i32
    return %c0_i32, %arg0 : i32, i32
  }
  func.func @transform_4(%arg0: i32, %arg1: i32) -> (i32, i32) {
    %c0_i32 = arith.constant 0 : i32
    %c0_i32_0 = arith.constant 0 : i32
    return %c0_i32, %arg0 : i32, i32
  }
}

</mosaic_0001>

<bundles_post_ra>
// kernel: _lambda_.1
= control target key start
LH: loop header
LB: loop body
LE: loop exit
PB: predicated region body
PF: predicated region fallthrough
CT: control target
= control target key end

     0   :  { %vm147_vm0 = vcmask 523264   ;;  %s815_s1 = inlined_call_operand.vmem [shape: bf16[64,128], index: 1, kind: input, shape index: {}]   ;;  %s816_s0 = inlined_call_operand.vmem [shape: bf16[128,64], index: 0, kind: input, shape index: {}]   ;;  %s817_s2 = inlined_call_operand.vmem [shape: f32[8,128], index: 2, kind: input, shape index: {}]   ;;  %s818_s3 = inlined_call_operand.vmem [shape: f32[8,128], index: 3, kind: input, shape index: {}]   ;;  %s819_s4 = inlined_call_operand.vmem [shape: f32[128,128], index: 4, kind: output, shape index: {}]  }
   0x1   :  { %v563_v0 = vld [vmem:[%s815_s1 + $0x18] sm:$0xff]   ;;  %v564_v1 = vld [vmem:[%s815_s1 + $0x10] sm:$0xff]   ;;  %v565_v2 = vld [vmem:[%s815_s1 + $0x8] sm:$0xff]  }
   0x2   :  { %531 = vmatprep.subr.bf16.mxu0 %v563_v0  ;;  %555 = vmatprep.subr.bf16.mxu1 %v563_v0  ;;  %v567_v3 = vld [vmem:[%s816_s0] sm:$0xff]   ;;  %v568_v6 = vld [vmem:[%s816_s0 + $0x8] sm:$0xff]   ;;  %v569_v8 = vld [vmem:[%s816_s0 + $0x10] sm:$0xff]  }
   0x3   :  { %532 = vmatpush3.bf16.msra.mxu0 %v563_v0  ;;  %559 = vmatpush3.bf16.msra.mxu1 %v563_v0  ;;  %v566_v4 = vld [vmem:[%s815_s1] sm:$0xff]   ;;  %v572_v7 = vld [vmem:[%s816_s0 + $0x28] sm:$0xff]   ;;  %v573_v9 = vld [vmem:[%s816_s0 + $0x30] sm:$0xff]  }
   0x4   :  { %533 = vmatprep.subr.bf16.mxu0 %v564_v1  ;;  %556 = vmatprep.subr.bf16.mxu1 %v564_v1  ;;  %v571_v5 = vld [vmem:[%s816_s0 + $0x20] sm:$0xff]   ;;  %v570_v10 = vld [vmem:[%s816_s0 + $0x18] sm:$0xff]  }
   0x5   :  { %539 = vmatprep.mubr.msk.bf16.mxu0 %vm147_vm0, %v567_v3  ;;  %547 = vmatprep.mubr.msk.bf16.mxu1 %vm147_vm0, %v571_v5  ;;  %v574_v11 = vld [vmem:[%s816_s0 + $0x38] sm:$0xff]   ;;  %v649_v17 = vld [vmem:[%s817_s2] ss:$0 sm:$0xff] }
   0x7   :  { %534 = vmatpush3.bf16.msra.mxu0 %v564_v1  ;;  %560 = vmatpush3.bf16.msra.mxu1 %v564_v1 }
   0x8   :  { %535 = vmatprep.subr.bf16.mxu0 %v565_v2  ;;  %557 = vmatprep.subr.bf16.mxu1 %v565_v2 }
   0xb   :  { %536 = vmatpush3.bf16.msra.mxu0 %v565_v2  ;;  %561 = vmatpush3.bf16.msra.mxu1 %v565_v2 }
   0xc   :  { %537 = vmatprep.subr.bf16.mxu0 %v566_v4  ;;  %558 = vmatprep.subr.bf16.mxu1 %v566_v4 }
   0xf   :  { %538 = vmatpush3.bf16.msra.mxu0 %v566_v4  ;;  %562 = vmatpush3.bf16.msra.mxu1 %v566_v4 }
  0x12   :  { %540 = vmatmul.mubr.msk.bf16.vlgmr.msra.gmra.mxu0 %vm147_vm0, %v568_v6  ;;  %548 = vmatmul.mubr.msk.bf16.vlgmr.msra.gmra.mxu1 %vm147_vm0, %v572_v7 }
  0x13   :  { %543 = vmatprep.mubr.msk.bf16.mxu0 %vm147_vm0, %v569_v8  ;;  %551 = vmatprep.mubr.msk.bf16.mxu1 %vm147_vm0, %v573_v9 }
  0x1a   :  { %544 = vmatmul.mubr.msk.bf16.gmra.mxu0 %vm147_vm0, %v570_v10  ;;  %552 = vmatmul.mubr.msk.bf16.gmra.mxu1 %vm147_vm0, %v574_v11 }
  0xd2   :  { %v541_v12 = vpop.f32.mrf.mxu0  ;;  %v549_v13 = vpop.f32.mrf.mxu1 }
  0xd3   :  { %v658_v22 = vadd.f32 %v541_v12, %v649_v17  ;;  %v707_v60 = vadd.f32 %v549_v13, %v649_v17 }
  0xd4   :  { %v206_v14 = vpop.f32.mrf.mxu0  ;;  %v238_v15 = vpop.f32.mrf.mxu1 }
  0xd5   :  { %v652_v18 = vadd.f32 %v649_v17, %v206_v14  ;;  %v344_v31 = vmul.f32 %v658_v22, %v658_v22  ;;  %v695_v51 = vadd.f32 %v649_v17, %v238_v15  ;;  %v352_v6 = vmul.f32 %v707_v60, %v707_v60 }
  0xd6   :  { %v542_v16 = vpop.f32.mrf.mxu0  ;;  %v550_v21 = vpop.f32.mrf.mxu1 }
  0xd7   :  { %v342_v26 = vmul.f32 %v652_v18, %v652_v18  ;;  %v667_v27 = vadd.f32 %v542_v16, %v649_v17  ;;  %v350_v61 = vmul.f32 %v695_v51, %v695_v51  ;;  %v713_v0 = vadd.f32 %v550_v21, %v649_v17 }
  0xd8   :  { %v209_v19 = vpop.f32.mrf.mxu0  ;;  %v241_v29 = vpop.f32.mrf.mxu1 }
  0xd9   :  { %v655_v20 = vadd.f32 %v649_v17, %v209_v19  ;;  %v345_v37 = vmul.f32 %v667_v27, %v667_v27  ;;  %v701_v55 = vadd.f32 %v649_v17, %v241_v29  ;;  %v353_v10 = vmul.f32 %v713_v0, %v713_v0 }
  0xda   :  { %v545_v23 = vpop.f32.mrf.mxu0  ;;  %v553_v40 = vpop.f32.mrf.mxu1 }
  0xdb   :  { %v343_v24 = vmul.f32 %v655_v20, %v655_v20  ;;  %v320_v25 = vadd.f32 %v655_v20, %v652_v18  ;;  %v683_v42 = vadd.f32 %v545_v23, %v649_v17  ;;  %v351_v1 = vmul.f32 %v701_v55, %v701_v55 }
  0xdc   :  { %v222_v28 = vpop.f32.mrf.mxu0  ;;  %v254_v49 = vpop.f32.mrf.mxu1  ;;  %v283_v13 = vadd.f32 %v553_v40, %v649_v17 }
  0xdd   :  { %v321_v30 = vadd.f32 %v320_v25, %v658_v22  ;;  %v673_v32 = vadd.f32 %v649_v17, %v222_v28  ;;  %v358_v34 = vadd.f32 %v343_v24, %v342_v26  ;;  %v348_v52 = vmul.f32 %v683_v42, %v683_v42 }
  0xde   :  { %v546_v33 = vpop.f32.mrf.mxu0  ;;  %v554_v58 = vpop.f32.mrf.mxu1  ;;  %v719_v5 = vadd.f32 %v649_v17, %v254_v49  ;;  %v356_v25 = vmul.f32 %v283_v13, %v283_v13 }
  0xdf   :  { %v322_v35 = vadd.f32 %v321_v30, %v667_v27  ;;  %v359_v38 = vadd.f32 %v358_v34, %v344_v31  ;;  %v346_v43 = vmul.f32 %v673_v32, %v673_v32  ;;  %v691_v47 = vadd.f32 %v546_v33, %v649_v17 }
  0xe0   :  { %v225_v36 = vpop.f32.mrf.mxu0  ;;  %v257_v3 = vpop.f32.mrf.mxu1  ;;  %v354_v14 = vmul.f32 %v719_v5, %v719_v5  ;;  %v284_v19 = vadd.f32 %v554_v58, %v649_v17 }
  0xe1   :  { %v679_v39 = vadd.f32 %v649_v17, %v225_v36  ;;  %v323_v41 = vadd.f32 %v322_v35, %v673_v32  ;;  %v360_v44 = vadd.f32 %v359_v38, %v345_v37  ;;  %v349_v56 = vmul.f32 %v691_v47, %v691_v47 }
  0xe2   :  { %v282_v9 = vadd.f32 %v649_v17, %v257_v3  ;;  %v357_v29 = vmul.f32 %v284_v19, %v284_v19 }
  0xe3   :  { %v324_v45 = vadd.f32 %v323_v41, %v679_v39  ;;  %v347_v46 = vmul.f32 %v679_v39, %v679_v39  ;;  %v361_v48 = vadd.f32 %v360_v44, %v346_v43 }
  0xe4   :  { %v355_v21 = vmul.f32 %v282_v9, %v282_v9 }
  0xe5   :  { %v325_v50 = vadd.f32 %v324_v45, %v683_v42  ;;  %v362_v53 = vadd.f32 %v361_v48, %v347_v46 }
  0xe7   :  { %v326_v54 = vadd.f32 %v325_v50, %v691_v47  ;;  %v363_v57 = vadd.f32 %v362_v53, %v348_v52 }
  0xe9   :  { %v327_v59 = vadd.f32 %v326_v54, %v695_v51  ;;  %v364_v62 = vadd.f32 %v363_v57, %v349_v56  ;;  %v390_v54 = vlaneseq  ;;  %v383_v57 = vld [vmem:[%s818_s3] sm:$0x1] }
  0xeb   :  { %v328_v63 = vadd.f32 %v327_v59, %v701_v55  ;;  %v365_v2 = vadd.f32 %v364_v62, %v350_v61  ;;  %v391_v56 = vshrl.u32 %v390_v54, 7  ;;  %v387_v62 = vld [vmem:[%s818_s3 + $0x1] sm:$0x1] }
  0xed   :  { %v329_v4 = vadd.f32 %v328_v63, %v707_v60  ;;  %v366_v7 = vadd.f32 %v365_v2, %v351_v1  ;;  %v392_v58 = vsub.s32 0, %v391_v56 }
  0xef   :  { %v330_v8 = vadd.f32 %v329_v4, %v713_v0  ;;  %v367_v11 = vadd.f32 %v366_v7, %v352_v6 }
  0xf1   :  { %v331_v12 = vadd.f32 %v330_v8, %v719_v5  ;;  %v368_v15 = vadd.f32 %v367_v11, %v353_v10 }
  0xf3   :  { %v332_v16 = vadd.f32 %v331_v12, %v282_v9  ;;  %v369_v23 = vadd.f32 %v368_v15, %v354_v14 }
  0xf5   :  { %v333_v24 = vadd.f32 %v332_v16, %v283_v13  ;;  %v370_v26 = vadd.f32 %v369_v23, %v355_v21 }
  0xf7   :  { %v334_v28 = vadd.f32 %v333_v24, %v284_v19  ;;  %v371_v30 = vadd.f32 %v370_v26, %v356_v25 }
  0xf9   :  { %v335_v31 = vrot.slane %v334_v28, 4  ;;  %v372_v33 = vadd.f32 %v371_v30, %v357_v29 }
  0xfb   :  { %v336_v34 = vadd.f32 %v335_v31, %v334_v28  ;;  %v373_v35 = vrot.slane %v372_v33, 4 }
  0xfd   :  { %v337_v36 = vrot.slane %v336_v34, 2  ;;  %v374_v37 = vadd.f32 %v373_v35, %v372_v33 }
  0xff   :  { %v338_v38 = vadd.f32 %v337_v36, %v336_v34  ;;  %v375_v40 = vrot.slane %v374_v37, 2 }
 0x101   :  { %v339_v41 = vrot.slane %v338_v38, 1  ;;  %v376_v43 = vadd.f32 %v375_v40, %v374_v37 }
 0x103   :  { %v340_v44 = vadd.f32 %v339_v41, %v338_v38  ;;  %v377_v17 = vrot.slane %v376_v43, 1 }
 0x105   :  { %v341_v45 = vmul.f32 0.0078125, %v340_v44  ;;  %v378_v46 = vadd.f32 %v377_v17, %v376_v43 }
 0x107   :  { %v380_v48 = vmul.f32 %v341_v45, %v341_v45  ;;  %v379_v49 = vmul.f32 0.0078125, %v378_v46 }
 0x109   :  { %v381_v50 = vsub.f32 %v379_v49, %v380_v48 }
 0x10b   :  { %v382_v52 = vmax.f32 %v381_v50, 0.0 }
 0x10d   :  { %v384_v53 = vadd.f32 1e-05, %v382_v52 }
 0x10f   :  { %575 = vrsqrt.f32 %v384_v53 }
 0x11c   :  { %v576_v59 = vpop.eup %575 }
 0x11d   :  { %v386_v61 = vmul.f32 %v576_v59, %v383_v57 }
 0x11f   :  { %v388_v63 = vmul.f32 %v386_v61, %v341_v45  ;;  %v393_v1 = vrot.slane %v386_v61, %v392_v58 }
 0x121   :  { %v389_v2 = vsub.f32 %v387_v62, %v388_v63  ;;  %v394_v3 = vmul.f32 %v393_v1, %v652_v18  ;;  %v395_v4 = vmul.f32 %v393_v1, %v655_v20  ;;  %v396_v6 = vmul.f32 %v393_v1, %v658_v22 }
 0x122   :  { %v397_v7 = vmul.f32 %v393_v1, %v667_v27  ;;  %v398_v8 = vmul.f32 %v393_v1, %v673_v32  ;;  %v399_v10 = vmul.f32 %v393_v1, %v679_v39  ;;  %v400_v11 = vmul.f32 %v393_v1, %v683_v42 }
 0x123   :  { %v401_v12 = vmul.f32 %v393_v1, %v691_v47  ;;  %v402_v14 = vmul.f32 %v393_v1, %v695_v51  ;;  %v403_v15 = vmul.f32 %v393_v1, %v701_v55  ;;  %v404_v18 = vmul.f32 %v393_v1, %v707_v60 }
 0x124   :  { %v405_v20 = vmul.f32 %v393_v1, %v713_v0  ;;  %v413_v16 = vrot.slane %v389_v2, %v392_v58  ;;  %v406_v22 = vmul.f32 %v393_v1, %v719_v5  ;;  %v407_v27 = vmul.f32 %v393_v1, %v282_v9 }
 0x125   :  { %v408_v21 = vmul.f32 %v393_v1, %v283_v13  ;;  %v409_v32 = vmul.f32 %v393_v1, %v284_v19 }
 0x126   :  { %v414_v23 = vadd.f32 %v413_v16, %v394_v3  ;;  %v415_v39 = vadd.f32 %v413_v16, %v395_v4  ;;  %v416_v24 = vadd.f32 %v413_v16, %v396_v6  ;;  %v417_v42 = vadd.f32 %v413_v16, %v397_v7 }
 0x127   :  { %v418_v25 = vadd.f32 %v413_v16, %v398_v8  ;;  %v419_v47 = vadd.f32 %v413_v16, %v399_v10  ;;  %v420_v26 = vadd.f32 %v413_v16, %v400_v11  ;;  %v421_v51 = vadd.f32 %v413_v16, %v401_v12 }
 0x128   :  { %v422_v28 = vadd.f32 %v413_v16, %v402_v14  ;;  %v423_v55 = vadd.f32 %v413_v16, %v403_v15  ;;  %v424_v29 = vadd.f32 %v413_v16, %v404_v18  ;;  %v425_v60 = vadd.f32 %v413_v16, %v405_v20 }
 0x129   :  { %v426_v30 = vadd.f32 %v413_v16, %v406_v22  ;;  %v427_v0 = vadd.f32 %v413_v16, %v407_v27  ;;  %v428_v31 = vadd.f32 %v413_v16, %v408_v21  ;;  %v429_v33 = vadd.f32 %v413_v16, %v409_v32 }
 0x12a   :  { %vm430_vm1 = vcmp.ge.f32.partialorder %v414_v23, 0.0  ;;  %vm431_vm2 = vcmp.ge.f32.partialorder %v415_v39, 0.0  ;;  %vm432_vm3 = vcmp.ge.f32.partialorder %v416_v24, 0.0  ;;  %vm433_vm4 = vcmp.ge.f32.partialorder %v417_v42, 0.0 }
 0x12b   :  { %vm434_vm5 = vcmp.ge.f32.partialorder %v418_v25, 0.0  ;;  %vm435_vm6 = vcmp.ge.f32.partialorder %v419_v47, 0.0  ;;  %vm436_vm7 = vcmp.ge.f32.partialorder %v420_v26, 0.0  ;;  %vm437_vm8 = vcmp.ge.f32.partialorder %v421_v51, 0.0 }
 0x12c   :  { %vm438_vm9 = vcmp.ge.f32.partialorder %v422_v28, 0.0  ;;  %vm439_vm10 = vcmp.ge.f32.partialorder %v423_v55, 0.0  ;;  %vm440_vm11 = vcmp.ge.f32.partialorder %v424_v29, 0.0  ;;  %vm441_vm12 = vcmp.ge.f32.partialorder %v425_v60, 0.0 }
 0x12d   :  { %vm442_vm13 = vcmp.ge.f32.partialorder %v426_v30, 0.0  ;;  %vm443_vm14 = vcmp.ge.f32.partialorder %v427_v0, 0.0  ;;  %vm444_vm15 = vcmp.ge.f32.partialorder %v428_v31, 0.0  ;;  %vm445_vm0 = vcmp.ge.f32.partialorder %v429_v33, 0.0 }
 0x12e   :  { %v446_v5 = vmul.f32 0.2, %v414_v23  ;;  %v447_v9 = vmul.f32 0.2, %v415_v39  ;;  %v448_v13 = vmul.f32 0.2, %v416_v24 }
 0x12f   :  { %v449_v19 = vmul.f32 0.2, %v417_v42  ;;  %v450_v34 = vmul.f32 0.2, %v418_v25  ;;  %v451_v35 = vmul.f32 0.2, %v419_v47 }
 0x130   :  { %v452_v36 = vmul.f32 0.2, %v420_v26  ;;  %v453_v37 = vmul.f32 0.2, %v421_v51  ;;  %v454_v38 = vmul.f32 0.2, %v422_v28  ;;  %v462_v40 = vsel %vm430_vm1, %v414_v23, %v446_v5 }
 0x131   :  { %v455_v41 = vmul.f32 0.2, %v423_v55  ;;  %v456_v43 = vmul.f32 0.2, %v424_v29  ;;  %v457_v44 = vmul.f32 0.2, %v425_v60  ;;  %v463_v17 = vsel %vm431_vm2, %v415_v39, %v447_v9  ;;  %478 = vst [vmem:[%s819_s4] sm:$0xff] %v462_v40 }
 0x132   :  { %v458_v45 = vmul.f32 0.2, %v426_v30  ;;  %v459_v46 = vmul.f32 0.2, %v427_v0  ;;  %v460_v48 = vmul.f32 0.2, %v428_v31  ;;  %v464_v49 = vsel %vm432_vm3, %v416_v24, %v448_v13 }
 0x133   :  { %479 = vst [vmem:[%s819_s4 + $0x8] sm:$0xff] %v463_v17  ;;  %v461_v50 = vmul.f32 0.2, %v429_v33  ;;  %v465_v52 = vsel %vm433_vm4, %v417_v42, %v449_v19  ;;  %v466_v53 = vsel %vm434_vm5, %v418_v25, %v450_v34  ;;  %v467_v54 = vsel %vm435_vm6, %v419_v47, %v451_v35  ;;  %480 = vst [vmem:[%s819_s4 + $0x10] sm:$0xff] %v464_v49 }
 0x134   :  { %v468_v56 = vsel %vm436_vm7, %v420_v26, %v452_v36  ;;  %v469_v57 = vsel %vm437_vm8, %v421_v51, %v453_v37  ;;  %v470_v58 = vsel %vm438_vm9, %v422_v28, %v454_v38  ;;  %v471_v59 = vsel %vm439_vm10, %v423_v55, %v455_v41  ;;  %481 = vst [vmem:[%s819_s4 + $0x18] sm:$0xff] %v465_v52 }
 0x135   :  { %482 = vst [vmem:[%s819_s4 + $0x20] sm:$0xff] %v466_v53  ;;  %483 = vst [vmem:[%s819_s4 + $0x28] sm:$0xff] %v467_v54  ;;  %v472_v61 = vsel %vm440_vm11, %v424_v29, %v456_v43  ;;  %v473_v62 = vsel %vm441_vm12, %v425_v60, %v457_v44  ;;  %v474_v63 = vsel %vm442_vm13, %v426_v30, %v458_v45 }
 0x136   :  { %v475_v1 = vsel %vm443_vm14, %v427_v0, %v459_v46  ;;  %484 = vst [vmem:[%s819_s4 + $0x30] sm:$0xff] %v468_v56  ;;  %485 = vst [vmem:[%s819_s4 + $0x38] sm:$0xff] %v469_v57  ;;  %v476_v2 = vsel %vm444_vm15, %v428_v31, %v460_v48  ;;  %v477_v3 = vsel %vm445_vm0, %v429_v33, %v461_v50 }
 0x137   :  { %486 = vst [vmem:[%s819_s4 + $0x40] sm:$0xff] %v470_v58  ;;  %487 = vst [vmem:[%s819_s4 + $0x48] sm:$0xff] %v471_v59 }
 0x138   :  { %488 = vst [vmem:[%s819_s4 + $0x50] sm:$0xff] %v472_v61  ;;  %489 = vst [vmem:[%s819_s4 + $0x58] sm:$0xff] %v473_v62 }
 0x139   :  { %490 = vst [vmem:[%s819_s4 + $0x60] sm:$0xff] %v474_v63  ;;  %491 = vst [vmem:[%s819_s4 + $0x68] sm:$0xff] %v475_v1 }
 0x13a   :  { %492 = vst [vmem:[%s819_s4 + $0x70] sm:$0xff] %v476_v2  ;;  %493 = vst [vmem:[%s819_s4 + $0x78] sm:$0xff] %v477_v3 }

</bundles_post_ra>
